<compile_context>
chip_gen: v6e
topology: v6e:2x2x1
jax: 0.10.0
libtpu: 0.0.40
codegen_flags: <defaults>
</compile_context>

<pallas_src>
import jax
import jax.numpy as jnp
from jax import lax
from jax.experimental import pallas as pl
from jax.experimental.pallas import tpu as pltpu

_SUBLANES = 8  # f32 sublane count; w3 row is replicated to this many rows


def value_net_kernel(x_ref, w1_ref, b1_ref, w2_ref, b2_ref, w3_ref, b3_ref, o_ref):
    # fc1 + relu : bf16 MXU matmul, f32 accumulate, f32 epilogue.
    h1 = jnp.dot(x_ref[...], w1_ref[...], preferred_element_type=jnp.float32)
    h1 = jnp.maximum(h1 + b1_ref[...], 0.0)

    # fc2 + relu
    h2 = jnp.dot(h1.astype(jnp.bfloat16), w2_ref[...],
                 preferred_element_type=jnp.float32)
    h2 = jnp.maximum(h2 + b2_ref[...], 0.0)

    # v head: (8, F2) @ (TM, F2)^T -> (8, TM); row 0 is the result.
    # This makes the per-tile output a lane-dense (1, TM) row (unmasked stores) and
    # avoids the degenerate N=1 MXU matmul of the naive h2 @ w3 formulation.
    v = lax.dot_general(
        w3_ref[...], h2.astype(jnp.bfloat16),
        dimension_numbers=(((1,), (1,)), ((), ())),
        preferred_element_type=jnp.float32)

    o_ref[...] = (v[0:1, :] + b3_ref[0, 0]).astype(o_ref.dtype)


def value_network_forward(state, params):
    """state: (B, D_in) float32. params: dict with W1,b1,W2,b2,W3,b3 (f32, x@W layout)."""
    B, d_in = state.shape
    f2 = params["W2"].shape[1]

    bf16 = jnp.bfloat16
    x = state.astype(bf16)
    w1 = params["W1"].astype(bf16)
    w2 = params["W2"].astype(bf16)
    w3 = jnp.tile(params["W3"].reshape(1, f2).astype(bf16), (_SUBLANES, 1))  # (8, F2)
    b1 = params["b1"].astype(jnp.float32)
    b2 = params["b2"].astype(jnp.float32)
    b3 = params["b3"].reshape(1, 1).astype(jnp.float32)                      # SMEM scalar

    # Batch tile: lane/sublane aligned (256 or 512) when tiling; whole batch when small
    # (full-array block shapes are exempt from the (8,128) divisibility rule).
    if B <= 256:
        tm = B
    elif B <= 2048:
        tm = 256
    else:
        tm = 512
    grid = (pl.cdiv(B, tm),)

    def resident(a):
        # Whole array, constant index_map -> DMA'd once, VMEM-resident across grid steps.
        return pl.BlockSpec(a.shape, lambda i: (0,) * a.ndim)

    out_row = pl.pallas_call(
        value_net_kernel,
        out_shape=jax.ShapeDtypeStruct((1, B), jnp.float32),
        grid=grid,
        in_specs=[
            pl.BlockSpec((tm, d_in), lambda i: (i, 0)),            # state tiles (pipelined)
            resident(w1), resident(b1),
            resident(w2), resident(b2),
            resident(w3),
            pl.BlockSpec(memory_space=pltpu.MemorySpace.SMEM),     # b3 scalar in SMEM
        ],
        out_specs=pl.BlockSpec((1, tm), lambda i: (0, i)),         # lane-dense output row
        compiler_params=pltpu.CompilerParams(
            dimension_semantics=("parallel",)),
    )(x, w1, b1, w2, b2, w3, b3)

    return out_row.reshape(B, 1)


def init_params(key, input_dims, fc1_dims, fc2_dims):
    """Deterministic init mimicking nn.Linear default (U[-1/sqrt(fan_in), 1/sqrt(fan_in)])."""
    ks = jax.random.split(key, 6)

    def lin(kw, kb, fan_in, fan_out):
        bound = 1.0 / jnp.sqrt(fan_in)
        w = jax.random.uniform(kw, (fan_in, fan_out), jnp.float32, -bound, bound)
        b = jax.random.uniform(kb, (1, fan_out), jnp.float32, -bound, bound)
        return w, b

    W1, b1 = lin(ks[0], ks[1], input_dims, fc1_dims)
    W2, b2 = lin(ks[2], ks[3], fc1_dims, fc2_dims)
    W3, b3 = lin(ks[4], ks[5], fc2_dims, 1)
    return {"W1": W1, "b1": b1, "W2": W2, "b2": b2, "W3": W3, "b3": b3}


def value_network_ref(state, p):
    """bf16-matmul / f32-accumulate reference mirroring the kernel's numerics."""
    bf, f32 = jnp.bfloat16, jnp.float32
    h1 = jnp.maximum(jnp.dot(state.astype(bf), p["W1"].astype(bf),
                             preferred_element_type=f32) + p["b1"], 0.0)
    h2 = jnp.maximum(jnp.dot(h1.astype(bf), p["W2"].astype(bf),
                             preferred_element_type=f32) + p["b2"], 0.0)
    return jnp.dot(h2.astype(bf), p["W3"].astype(bf),
                   preferred_element_type=f32) + p["b3"]


if __name__ == "__main__":
    key = jax.random.PRNGKey(0)
    k_x1, k_x2, k_p = jax.random.split(key, 3)

    input_dims = 8     # e.g. LunarLander observation dim
    fc1_dims = 128     # MXU/lane aligned hidden sizes
    fc2_dims = 128
    params = init_params(k_p, input_dims, fc1_dims, fc2_dims)

    # Small batch: single-block path (grid=(1,), full-dim blocks).
    s_small = jax.random.normal(k_x1, (32, input_dims), jnp.float32)
    v_small = jax.block_until_ready(value_network_forward(s_small, params))
    r_small = value_network_ref(s_small, params)
    assert v_small.shape == (32, 1)
    assert jnp.allclose(v_small, r_small, atol=2e-3, rtol=2e-3)

    # Larger batch: tiled path, grid=(3,) with a ragged final tile (640 = 2*256 + 128).
    s_big = jax.random.normal(k_x2, (640, input_dims), jnp.float32)
    v_big = jax.block_until_ready(value_network_forward(s_big, params))
    r_big = value_network_ref(s_big, params)
    assert v_big.shape == (640, 1)
    assert jnp.allclose(v_big, r_big, atol=2e-3, rtol=2e-3)

    print("KERNEL_OK")
</pallas_src>

<mosaic_0001>
module attributes {stable_mosaic.version = 11 : i64} {
  func.func @value_net_kernel(%arg0: i32, %arg1: memref<32x8xbf16, #tpu.memory_space<vmem>>, %arg2: memref<8x128xbf16, #tpu.memory_space<vmem>>, %arg3: memref<1x128xf32, #tpu.memory_space<vmem>>, %arg4: memref<128x128xbf16, #tpu.memory_space<vmem>>, %arg5: memref<1x128xf32, #tpu.memory_space<vmem>>, %arg6: memref<8x128xbf16, #tpu.memory_space<vmem>>, %arg7: memref<1x1xf32, #tpu.memory_space<smem>>, %arg8: memref<1x32xf32, #tpu.memory_space<vmem>>) attributes {dimension_semantics = [#tpu.dimension_semantics<parallel>], iteration_bounds = array<i64: 1>, scalar_prefetch = 0 : i64, scratch_operands = 0 : i64, tpu.core_type = #tpu.core_type<tc>, window_params = [{transform_indices = @transform_0, window_bounds = array<i64: 32, 8>}, {pipeline_mode = #tpu.pipeline_mode<synchronous>, transform_indices = @transform_1, window_bounds = array<i64: 8, 128>}, {pipeline_mode = #tpu.pipeline_mode<synchronous>, transform_indices = @transform_2, window_bounds = array<i64: 1, 128>}, {pipeline_mode = #tpu.pipeline_mode<synchronous>, transform_indices = @transform_3, window_bounds = array<i64: 128, 128>}, {pipeline_mode = #tpu.pipeline_mode<synchronous>, transform_indices = @transform_4, window_bounds = array<i64: 1, 128>}, {pipeline_mode = #tpu.pipeline_mode<synchronous>, transform_indices = @transform_5, window_bounds = array<i64: 8, 128>}, {transform_indices = @transform_6, window_bounds = array<i64: 1, 1>}, {transform_indices = @transform_7, window_bounds = array<i64: 1, 32>}]} {
    %c0 = arith.constant 0 : index
    %c0_0 = arith.constant 0 : index
    %0 = vector.load %arg1[%c0, %c0_0] : memref<32x8xbf16, #tpu.memory_space<vmem>>, vector<32x8xbf16>
    %c0_1 = arith.constant 0 : index
    %c0_2 = arith.constant 0 : index
    %1 = vector.load %arg2[%c0_1, %c0_2] : memref<8x128xbf16, #tpu.memory_space<vmem>>, vector<8x128xbf16>
    %cst = arith.constant dense<0.000000e+00> : vector<32x128xf32>
    %2 = tpu.matmul %0, %1, %cst {dimension_numbers = #tpu.dot_dimension_numbers<[1], [0], [0], [1], [0, 0, 1, 1], [], []>} : vector<32x8xbf16>, vector<8x128xbf16>, vector<32x128xf32> -> vector<32x128xf32>
    %c0_3 = arith.constant 0 : index
    %c0_4 = arith.constant 0 : index
    %3 = vector.load %arg3[%c0_3, %c0_4] : memref<1x128xf32, #tpu.memory_space<vmem>>, vector<1x128xf32>
    %4 = vector.broadcast %3 : vector<1x128xf32> to vector<32x128xf32>
    %5 = arith.addf %2, %4 : vector<32x128xf32>
    %cst_5 = arith.constant 0.000000e+00 : f32
    %6 = vector.broadcast %cst_5 : f32 to vector<32x128xf32>
    %7 = arith.maximumf %5, %6 : vector<32x128xf32>
    %8 = arith.truncf %7 : vector<32x128xf32> to vector<32x128xbf16>
    %c0_6 = arith.constant 0 : index
    %c0_7 = arith.constant 0 : index
    %9 = vector.load %arg4[%c0_6, %c0_7] : memref<128x128xbf16, #tpu.memory_space<vmem>>, vector<128x128xbf16>
    %cst_8 = arith.constant dense<0.000000e+00> : vector<32x128xf32>
    %10 = tpu.matmul %8, %9, %cst_8 {dimension_numbers = #tpu.dot_dimension_numbers<[1], [0], [0], [1], [0, 0, 1, 1], [], []>} : vector<32x128xbf16>, vector<128x128xbf16>, vector<32x128xf32> -> vector<32x128xf32>
    %c0_9 = arith.constant 0 : index
    %c0_10 = arith.constant 0 : index
    %11 = vector.load %arg5[%c0_9, %c0_10] : memref<1x128xf32, #tpu.memory_space<vmem>>, vector<1x128xf32>
    %12 = vector.broadcast %11 : vector<1x128xf32> to vector<32x128xf32>
    %13 = arith.addf %10, %12 : vector<32x128xf32>
    %cst_11 = arith.constant 0.000000e+00 : f32
    %14 = vector.broadcast %cst_11 : f32 to vector<32x128xf32>
    %15 = arith.maximumf %13, %14 : vector<32x128xf32>
    %c0_12 = arith.constant 0 : index
    %c0_13 = arith.constant 0 : index
    %16 = vector.load %arg6[%c0_12, %c0_13] : memref<8x128xbf16, #tpu.memory_space<vmem>>, vector<8x128xbf16>
    %17 = arith.truncf %15 : vector<32x128xf32> to vector<32x128xbf16>
    %cst_14 = arith.constant dense<0.000000e+00> : vector<8x32xf32>
    %18 = tpu.matmul %16, %17, %cst_14 {dimension_numbers = #tpu.dot_dimension_numbers<[1], [1], [0], [0], [0, 0, 1, 0], [], []>} : vector<8x128xbf16>, vector<32x128xbf16>, vector<8x32xf32> -> vector<8x32xf32>
    %19 = vector.extract_strided_slice %18 {offsets = [0, 0], sizes = [1, 32], strides = [1, 1]} : vector<8x32xf32> to vector<1x32xf32>
    %c0_15 = arith.constant 0 : index
    %c0_16 = arith.constant 0 : index
    %20 = memref.load %arg7[%c0_15, %c0_16] : memref<1x1xf32, #tpu.memory_space<smem>>
    %21 = vector.broadcast %20 : f32 to vector<1x32xf32>
    %22 = arith.addf %19, %21 : vector<1x32xf32>
    %c0_17 = arith.constant 0 : index
    %c0_18 = arith.constant 0 : index
    %23 = vector.load %arg8[%c0_17, %c0_18] : memref<1x32xf32, #tpu.memory_space<vmem>>, vector<1x32xf32>
    tpu.vector_store %arg8[%c0_17, %c0_18], %22 {strides = array<i32>} : memref<1x32xf32, #tpu.memory_space<vmem>>, vector<1x32xf32>,
    return
  }
  func.func @transform_0(%arg0: i32) -> (i32, i32) {
    %c0_i32 = arith.constant 0 : i32
    %c0_i32_0 = arith.constant 0 : i32
    return %arg0, %c0_i32 : i32, i32
  }
  func.func @transform_1(%arg0: i32) -> (i32, i32) {
    %c0_i32 = arith.constant 0 : i32
    %c0_i32_0 = arith.constant 0 : i32
    %c0_i32_1 = arith.constant 0 : i32
    return %c0_i32, %c0_i32_0 : i32, i32
  }
  func.func @transform_2(%arg0: i32) -> (i32, i32) {
    %c0_i32 = arith.constant 0 : i32
    %c0_i32_0 = arith.constant 0 : i32
    %c0_i32_1 = arith.constant 0 : i32
    return %c0_i32, %c0_i32_0 : i32, i32
  }
  func.func @transform_3(%arg0: i32) -> (i32, i32) {
    %c0_i32 = arith.constant 0 : i32
    %c0_i32_0 = arith.constant 0 : i32
    %c0_i32_1 = arith.constant 0 : i32
    return %c0_i32, %c0_i32_0 : i32, i32
  }
  func.func @transform_4(%arg0: i32) -> (i32, i32) {
    %c0_i32 = arith.constant 0 : i32
    %c0_i32_0 = arith.constant 0 : i32
    %c0_i32_1 = arith.constant 0 : i32
    return %c0_i32, %c0_i32_0 : i32, i32
  }
  func.func @transform_5(%arg0: i32) -> (i32, i32) {
    %c0_i32 = arith.constant 0 : i32
    %c0_i32_0 = arith.constant 0 : i32
    %c0_i32_1 = arith.constant 0 : i32
    return %c0_i32, %c0_i32_0 : i32, i32
  }
  func.func @transform_6(%arg0: i32) -> (i32, i32) {
    %c0_i32 = arith.constant 0 : i32
    %c0_i32_0 = arith.constant 0 : i32
    %c0_i32_1 = arith.constant 0 : i32
    return %c0_i32, %c0_i32_0 : i32, i32
  }
  func.func @transform_7(%arg0: i32) -> (i32, i32) {
    %c0_i32 = arith.constant 0 : i32
    %c0_i32_0 = arith.constant 0 : i32
    return %c0_i32, %arg0 : i32, i32
  }
}

</mosaic_0001>

<bundles_post_ra>
// kernel: tpu_custom_call.1
= control target key start
LH: loop header
LB: loop body
LE: loop exit
PB: predicated region body
PF: predicated region fallthrough
CT: control target
= control target key end

     0   :  { %13 = vsyncpa [#allocation4], 0  ;;  %s516_s0 = inlined_call_operand.vmem [shape: bf16[32,8], index: 0, kind: input, shape index: {}]   ;;  %s517_s1 = inlined_call_operand.vmem [shape: bf16[8,128], index: 1, kind: input, shape index: {}]   ;;  %s518_s2 = inlined_call_operand.vmem [shape: f32[1,128], index: 2, kind: input, shape index: {}]   ;;  %s519_s3 = inlined_call_operand.hbm [shape: bf16[128,128], index: 3, kind: input, shape index: {}]   ;;  %s520_s4 = inlined_call_operand.vmem [shape: f32[1,128], index: 4, kind: input, shape index: {}]   ;;  %s521_s5 = inlined_call_operand.vmem [shape: bf16[8,128], index: 5, kind: input, shape index: {}]   ;;  %s522_s6 = inlined_call_operand.<no memory space> [shape: f32[1,1], index: 6, kind: input, shape index: {}]   ;;  %s523_s7 = inlined_call_operand.hbm [shape: f32[1,32], index: 7, kind: output, shape index: {}]  }
   0x1   :  { %14 = vsyncpa [#allocation5], 0  ;;  %s443_s24 = smov [#allocation3]  }
   0x2   :  { %s26_s25 = sshll.u32 %s443_s24, 4  ;;  %s27_s25 = int_to_ptr.vmem [resolvable:$true] %s26_s25 }
   0x3   :  { %s407_s26 = scalar_lea.vmem %s27_s25, 1024  ;;  %p412_p1 = scmp.lt.s32.totalorder %s27_s25, %s27_s25 }
   0x4   :  { %p408_p0 = scmp.ne.s32.totalorder %s27_s25, %s407_s26  ;;  %p413_p2 = scmp.lt.s32.totalorder %s407_s26, %s407_s26 }
   0x6   :  { %p414_p3 = por %p413_p2, %p412_p1 }
   0x8   :  { %p415_p4 = pnand %p414_p3, %p408_p0 }
   0xa   :  { %418 = shalt.err (!%p415_p4)
}
   0xb   :  { %s444_s27 = smov 64   ;;  %s445_s28 = smov 4  }
   0xc   :  { %32 = dma.hbm_to_vmem [thread:$0]  %s519_s3, 1024, %s27_s25, [#allocation4], %s444_s27, %s444_s27, %s445_s28  }
   0xd   :  { %439 = dma.done.wait [#allocation4], 1024  }
   0xe   :  { %440 = vsyncadd [#allocation4], 4294966272  ;;  %vm72_vm0 = vcmask 1043456   ;;  %vm65_vm1 = vcmask 64512   ;;  %v47_v0 = vld [vmem:[%s517_s1] sm:$0xf]  ;;  %v299_v44 = vstv %s522_s6 }
   0xf   :  { %382 = vmatprep.subr.msk.bf16.mxu0 %vm72_vm0, %v47_v0  ;;  %v74_v1 = vsel %vm72_vm0, %v47_v0, 0  ;;  %v389_v2 = vld [vmem:[%s516_s0] sm:$0xff]   ;;  %v390_v3 = vld [vmem:[%s516_s0 + $0x8] sm:$0xff]   ;;  %v391_v4 = vld [vmem:[#allocation3 + $0x38] sm:$0xff]   ;;  %v446_v27 = vmov 0.0   ;;  %vm447_vm2 = vmmov 0  }
  0x10   :  { %349 = vmatpush3.bf16.msra.mxu0 %v74_v1  ;;  %350 = vmatprep.mubr.msk.bf16.mxu0 %vm65_vm1, %v389_v2  ;;  %v392_v5 = vld [vmem:[#allocation3 + $0x30] sm:$0xff]   ;;  %v393_v6 = vld [vmem:[#allocation3 + $0x28] sm:$0xff]   ;;  %v394_v7 = vld [vmem:[#allocation3 + $0x20] sm:$0xff]   ;;  %s448_s17 = smov [#allocation6]   ;;  %vm301_vm3 = vcmask 253952  }
  0x11   :  { %354 = vmatprep.subr.bf16.mxu1 %v391_v4  ;;  %v395_v8 = vld [vmem:[#allocation3 + $0x18] sm:$0xff]   ;;  %v396_v9 = vld [vmem:[#allocation3 + $0x10] sm:$0xff]   ;;  %v397_v10 = vld [vmem:[#allocation3 + $0x8] sm:$0xff]   ;;  %374 = vmatprep.subr.bf16.mxu0 %v446_v27  ;;  %s309_s18 = sshll.u32 %s448_s17, 4  ;;  %s310_s18 = int_to_ptr.vmem [resolvable:$true] %s309_s18 }
  0x12   :  { %355 = vmatpush3.bf16.msra.mxu1 %v391_v4  ;;  %v398_v11 = vld [vmem:[#allocation3] sm:$0xff]   ;;  %s419_s19 = scalar_lea.vmem %s310_s18, 16  ;;  %s423_s20 = scalar_lea.vmem %s310_s18, 32 }
  0x13   :  { %351 = vmatmul.mubr.msk.bf16.vlgmr.msra.gmra.mxu0 %vm65_vm1, %v390_v3  ;;  %356 = vmatprep.subr.bf16.mxu1 %v392_v5  ;;  %v318_v14 = vld [vmem:[%s518_s2] ss:$0 sm:$0xff]  ;;  %p420_p5 = scmp.ne.s32.totalorder %s310_s18, %s419_s19  ;;  %p424_p6 = scmp.lt.s32.totalorder %s310_s18, %s310_s18 }
  0x14   :  { %378 = vmatprep.mubr.msk.bf16.mxu0 %vm447_vm2, %v446_v27  ;;  %v323_v29 = vld [vmem:[%s520_s4] ss:$0 sm:$0xff]  ;;  %p425_p7 = scmp.lt.s32.totalorder %s423_s20, %s419_s19 }
  0x15   :  { %v255_v43 = vld [vmem:[%s521_s5] sm:$0xf] }
  0x16   :  { %357 = vmatpush3.bf16.msra.mxu1 %v392_v5  ;;  %p426_p8 = por %p425_p7, %p424_p6 }
  0x17   :  { %358 = vmatprep.subr.bf16.mxu1 %v393_v6 }
  0x18   :  { %p427_p9 = pnand %p426_p8, %p420_p5 }
  0x1a   :  { %359 = vmatpush3.bf16.msra.mxu1 %v393_v6 }
  0x1b   :  { %360 = vmatprep.subr.bf16.mxu1 %v394_v7 }
  0x1e   :  { %361 = vmatpush3.bf16.msra.mxu1 %v394_v7 }
  0x1f   :  { %362 = vmatprep.subr.bf16.mxu1 %v395_v8 }
  0x22   :  { %363 = vmatpush3.bf16.msra.mxu1 %v395_v8 }
  0x23   :  { %364 = vmatprep.subr.bf16.mxu1 %v396_v9 }
  0x26   :  { %365 = vmatpush3.bf16.msra.mxu1 %v396_v9 }
  0x27   :  { %366 = vmatprep.subr.bf16.mxu1 %v397_v10 }
  0x2a   :  { %367 = vmatpush3.bf16.msra.mxu1 %v397_v10 }
  0x2b   :  { %368 = vmatprep.subr.bf16.mxu1 %v398_v11 }
  0x2e   :  { %369 = vmatpush3.bf16.msra.mxu1 %v398_v11 }
  0xd3   :  { %v352_v12 = vpop.f32.mrf.mxu0 }
  0xd4   :  { %v119_v18 = vadd.f32 %v352_v12, %v318_v14 }
  0xd5   :  { %v110_v13 = vpop.f32.mrf.mxu0 }
  0xd6   :  { %v111_v16 = vadd.f32 %v318_v14, %v110_v13  ;;  %v127_v24 = vmax.f32 %v119_v18, 0.0 }
  0xd7   :  { %v353_v15 = vpop.f32.mrf.mxu0 }
  0xd8   :  { %v122_v17 = vadd.f32 %v353_v15, %v318_v14  ;;  %v125_v22 = vmax.f32 %v111_v16, 0.0 }
  0xd9   :  { %v113_v19 = vpop.f32.mrf.mxu0 }
  0xda   :  { %v114_v20 = vadd.f32 %v318_v14, %v113_v19  ;;  %v128_v21 = vmax.f32 %v122_v17, 0.0 }
  0xdc   :  { %v126_v23 = vmax.f32 %v114_v20, 0.0  ;;  %v130_v26 = vpack.c.bf16 %v128_v21, %v127_v24 }
  0xde   :  { %v129_v25 = vpack.c.bf16 %v126_v23, %v125_v22 }
  0xe0   :  { %370 = vmatprep.mubr.bf16.mxu1 %v129_v25 }
  0xe1   :  { %371 = vmatmul.mubr.bf16.vlgmr.msra.gmra.mxu1 %v130_v26 }
 0x1a1   :  { %v372_v28 = vpop.f32.mrf.mxu1 }
 0x1a2   :  { %v245_v31 = vadd.f32 %v372_v28, %v323_v29 }
 0x1a3   :  { %v236_v30 = vpop.f32.mrf.mxu1 }
 0x1a4   :  { %v253_v35 = vmax.f32 %v245_v31, 0.0  ;;  %v237_v39 = vadd.f32 %v323_v29, %v236_v30 }
 0x1a5   :  { %v373_v32 = vpop.f32.mrf.mxu1 }
 0x1a6   :  { %v248_v33 = vadd.f32 %v373_v32, %v323_v29  ;;  %v251_v41 = vmax.f32 %v237_v39, 0.0 }
 0x1a7   :  { %v239_v34 = vpop.f32.mrf.mxu1 }
 0x1a8   :  { %v254_v36 = vmax.f32 %v248_v33, 0.0  ;;  %v240_v38 = vadd.f32 %v323_v29, %v239_v34 }
 0x1aa   :  { %v257_v37 = vpack.c.bf16 %v254_v36, %v253_v35  ;;  %v252_v40 = vmax.f32 %v240_v38, 0.0 }
 0x1ac   :  { %375 = vmatpush3.bf16.xpose.msra.mxu0 %v257_v37  ;;  %v256_v42 = vpack.c.bf16 %v252_v40, %v251_v41 }
 0x1ad   :  { %376 = vmatprep.subr.bf16.mxu0 %v446_v27 }
 0x1b4   :  { %377 = vmatpush3.bf16.xpose.msra.mxu0 %v256_v42 }
 0x1bb   :  { %379 = vmatmul.mubr.bf16.vlgmr.msra.gmra.mxu0 %v255_v43 }
 0x27b   :  { %v292_v45 = vpop.f32.mrf.mxu0 }
 0x27c   :  { %v300_v46 = vadd.f32 %v299_v44, %v292_v45 }
 0x27d   :  { %v380_v47 = vpop.f32.mrf.mxu0 }
 0x27e   :  { %302 = vst.msk [vmem:[#allocation6] sm:$0x1] %vm301_vm3, %v300_v46 }
 0x27f   :  { %v295_v48 = vpop.f32.mrf.mxu0 }
 0x280   :  { %430 = shalt.err (!%p427_p9)
}
 0x281   :  { %312 = dma.vmem_to_hbm [thread:$0]  %s310_s18, 16, %s523_s7, [#allocation5]   ;;  %v381_v49 = vpop.f32.mrf.mxu0 }
 0x282   :  { %441 = dma.done.wait [#allocation5], 16  }
 0x283   :  { %442 = vsyncadd [#allocation5], 4294967280 }
 0x284   :  { %316 = vsyncpa [#allocation4], 1 }
 0x285   :  { %317 = vsyncpa [#allocation5], 1 }

</bundles_post_ra>
